<compile_context>
chip_gen: v5e
topology: v5e:2x2
jax: 0.10.0
libtpu: 0.0.40
codegen_flags: <defaults>
</compile_context>

<pallas_src>
import functools

import jax
import jax.numpy as jnp
from jax.experimental import pallas as pl
from jax.experimental.pallas import tpu as pltpu

HIDDEN = 768  # fixed by nn.Linear(768, num_labels) in the PyTorch module


def _round_up(x, m):
    return ((x + m - 1) // m) * m


def cls_head_kernel(x_ref, w_ref, b_ref, labels_ref, logits_ref, loss_ref, *,
                    num_classes, batch_total, tile_rows):
    """One batch tile of the classifier head + cross-entropy partial sum.

    x_ref:      (tb, 768)     f32   CLS-token hidden states (partial last tile OK)
    w_ref:      (768, Cp)     bf16  classifier weight, lane-padded with zeros (resident)
    b_ref:      (1, Cp)       f32   classifier bias, lane-padded with zeros (resident)
    labels_ref: (tb, 1)       i32   class labels
    logits_ref: (tb, C)       f32   narrow logits writeback (C == full output dim)
    loss_ref:   (1, 8, 128)   f32   per-tile loss partial, scalar broadcast into the tile
    """
    # In-kernel f32 -> bf16 cast (VPU, free under the HBM-bound DMA), MXU matmul with
    # f32 accumulation, bias add on the VPU.
    x = x_ref[...].astype(jnp.bfloat16)
    logits = jnp.dot(x, w_ref[...], preferred_element_type=jnp.float32) + b_ref[...]

    # Narrow writeback: only the real C columns leave VMEM.
    logits_ref[...] = logits[:, :num_classes]

    tb, cp = logits.shape
    col = jax.lax.broadcasted_iota(jnp.int32, (tb, cp), 1)

    # Mask lane-padded class columns before max/logsumexp so the loss matches unpadded math.
    masked = jnp.where(col < num_classes, logits, -1e30)
    m = jnp.max(masked, axis=-1, keepdims=True)
    lse = m + jnp.log(jnp.sum(jnp.exp(masked - m), axis=-1, keepdims=True))  # (tb, 1)

    # Vectorized one-hot gather of the target logit (labels < num_classes).
    onehot = (col == labels_ref[...]).astype(jnp.float32)
    target = jnp.sum(logits * onehot, axis=-1, keepdims=True)  # (tb, 1)

    # where-mask (not multiply) so garbage rows of a partial last tile cannot leak NaN/Inf.
    row = (pl.program_id(0) * tile_rows
           + jax.lax.broadcasted_iota(jnp.int32, (tb, 1), 0))
    per_row = jnp.where(row < batch_total, lse - target, 0.0)

    # Lane-dense (8,128) partial-sum block; wrapper reads element [i, 0, 0].
    loss_ref[...] = jnp.full(loss_ref.shape, jnp.sum(per_row), dtype=jnp.float32)


def classifier_head(cls_hidden, weight, bias, labels, *, max_tile_rows=1024):
    """cls_hidden (B,768) f32, weight (768,C) f32, bias (C,) f32, labels (B,) int."""
    B, H = cls_hidden.shape
    C = weight.shape[1]

    # 128 lanes is the native MXU width on every gen; wider only inflates VMEM/writeback.
    Cp = _round_up(max(C, 128), 128)

    # Balanced batch tiles: >=2 tiles (both v7x TCs), multiple of 16 rows, no padding pass.
    if B <= 16:
        tb = B                                   # single full-extent tile
    else:
        target_tiles = max(2, pl.cdiv(B, max_tile_rows))
        tb = _round_up(pl.cdiv(B, target_tiles), 16)
    num_tiles = pl.cdiv(B, tb)

    # Only the tiny classifier params are cast/padded in XLA; x streams straight from HBM.
    w_bf16 = jnp.pad(weight.astype(jnp.bfloat16), ((0, 0), (0, Cp - C)))
    b_f32 = jnp.pad(bias.astype(jnp.float32).reshape(1, C), ((0, 0), (0, Cp - C)))
    labels_2d = labels.astype(jnp.int32).reshape(B, 1)

    kernel = functools.partial(
        cls_head_kernel, num_classes=C, batch_total=B, tile_rows=tb)

    cost = pl.CostEstimate(
        flops=2 * B * H * Cp,
        transcendentals=B * Cp,
        bytes_accessed=(B * H * 4          # x (f32 read)
                        + H * Cp * 2       # weight (bf16, read once)
                        + Cp * 4           # bias
                        + B * 4            # labels
                        + B * C * 4        # logits writeback
                        + num_tiles * 8 * 128 * 4),  # loss partials
    )

    logits, loss_parts = pl.pallas_call(
        kernel,
        out_shape=(
            jax.ShapeDtypeStruct((B, C), jnp.float32),
            jax.ShapeDtypeStruct((num_tiles, 8, 128), jnp.float32),
        ),
        grid_spec=pltpu.PrefetchScalarGridSpec(
            num_scalar_prefetch=0,
            grid=(num_tiles,),
            in_specs=[
                pl.BlockSpec((tb, H), lambda i: (i, 0)),       # x tile, pipelined f32 stream
                pl.BlockSpec((H, Cp), lambda i: (0, 0)),       # weight, VMEM-resident
                pl.BlockSpec((1, Cp), lambda i: (0, 0)),       # bias, VMEM-resident
                pl.BlockSpec((tb, 1), lambda i: (i, 0)),       # labels tile
            ],
            out_specs=(
                pl.BlockSpec((tb, C), lambda i: (i, 0)),         # narrow logits writeback
                pl.BlockSpec((1, 8, 128), lambda i: (i, 0, 0)),  # per-tile loss partial
            ),
        ),
        compiler_params=pltpu.CompilerParams(
            dimension_semantics=("parallel",)),                  # tiles are independent
        cost_estimate=cost,
    )(cls_hidden.astype(jnp.float32), w_bf16, b_f32, labels_2d)

    loss = jnp.sum(loss_parts[:, 0, 0]) / B   # mean over the *global* batch
    return logits, loss


def backbone_stub(input_ids, attention_mask, emb_table):
    # TODO(synk): the pretrained HuggingFace AutoModel transformer backbone cannot be
    # reproduced without its checkpoint; stand-in is a deterministic embedding lookup
    # producing last_hidden_state of shape (B, S, 768).
    h = emb_table[input_ids]                      # (B, S, 768)
    return h * attention_mask[..., None]


if __name__ == "__main__":
    key = jax.random.PRNGKey(0)
    B, S, C, VOCAB = 2, 8, 4, 64
    k1, k2, k3, k4 = jax.random.split(key, 4)

    input_ids = jax.random.randint(k1, (B, S), 0, VOCAB)
    attention_mask = jnp.ones((B, S), jnp.float32)
    labels = jax.random.randint(k2, (B,), 0, C).astype(jnp.int32)

    # Deterministic parameter init (shapes implied by the module's __init__)
    emb_table = jax.random.normal(k3, (VOCAB, HIDDEN), jnp.float32) * 0.02
    clf_weight = jax.random.normal(k4, (HIDDEN, C), jnp.float32) * 0.02  # torch (C,768) transposed
    clf_bias = jnp.zeros((C,), jnp.float32)

    # Forward pass (mirrors ClassifierModel.forward)
    last_hidden_state = backbone_stub(input_ids, attention_mask, emb_table)
    cls_hidden = last_hidden_state[:, 0, :].reshape(-1, HIDDEN)          # [:, 0, :].view(-1, 768)
    logits, loss = classifier_head(cls_hidden, clf_weight, clf_bias, labels)
    jax.block_until_ready((logits, loss))

    # Reference check in plain JAX (same bf16-input / f32-accum matmul as the kernel)
    ref_logits = jnp.dot(cls_hidden.astype(jnp.bfloat16), clf_weight.astype(jnp.bfloat16),
                         preferred_element_type=jnp.float32) + clf_bias.reshape(1, C)
    ref_lse = jax.nn.logsumexp(ref_logits, axis=-1)
    ref_loss = jnp.mean(ref_lse - ref_logits[jnp.arange(B), labels])
    assert logits.shape == (B, C), "logits shape mismatch"
    assert jnp.allclose(logits, ref_logits, atol=2e-3), "logits mismatch"
    assert jnp.allclose(loss, ref_loss, atol=1e-4), "loss mismatch"

    print("KERNEL_OK")
</pallas_src>

<mosaic_0001>
module attributes {stable_mosaic.version = 11 : i64} {
  func.func @cls_head_kernel(%arg0: i32, %arg1: memref<2x768xf32, #tpu.memory_space<vmem>>, %arg2: memref<768x128xbf16, #tpu.memory_space<vmem>>, %arg3: memref<1x128xf32, #tpu.memory_space<vmem>>, %arg4: memref<2x1xi32, #tpu.memory_space<vmem>>, %arg5: memref<2x4xf32, #tpu.memory_space<vmem>>, %arg6: memref<1x8x128xf32, #tpu.memory_space<vmem>>) attributes {dimension_semantics = [#tpu.dimension_semantics<parallel>], iteration_bounds = array<i64: 1>, scalar_prefetch = 0 : i64, scratch_operands = 0 : i64, tpu.core_type = #tpu.core_type<tc>, window_params = [{transform_indices = @transform_0, window_bounds = array<i64: 2, 768>}, {pipeline_mode = #tpu.pipeline_mode<synchronous>, transform_indices = @transform_1, window_bounds = array<i64: 768, 128>}, {pipeline_mode = #tpu.pipeline_mode<synchronous>, transform_indices = @transform_2, window_bounds = array<i64: 1, 128>}, {transform_indices = @transform_3, window_bounds = array<i64: 2, 1>}, {transform_indices = @transform_4, window_bounds = array<i64: 2, 4>}, {transform_indices = @transform_5, window_bounds = array<i64: 1, 8, 128>}]} {
    %c0 = arith.constant 0 : index
    %c0_0 = arith.constant 0 : index
    %0 = vector.load %arg1[%c0, %c0_0] : memref<2x768xf32, #tpu.memory_space<vmem>>, vector<2x768xf32>
    %1 = arith.truncf %0 : vector<2x768xf32> to vector<2x768xbf16>
    %c0_1 = arith.constant 0 : index
    %c0_2 = arith.constant 0 : index
    %2 = vector.load %arg2[%c0_1, %c0_2] : memref<768x128xbf16, #tpu.memory_space<vmem>>, vector<768x128xbf16>
    %cst = arith.constant dense<0.000000e+00> : vector<2x128xf32>
    %3 = tpu.matmul %1, %2, %cst {dimension_numbers = #tpu.dot_dimension_numbers<[1], [0], [0], [1], [0, 0, 1, 1], [], []>} : vector<2x768xbf16>, vector<768x128xbf16>, vector<2x128xf32> -> vector<2x128xf32>
    %c0_3 = arith.constant 0 : index
    %c0_4 = arith.constant 0 : index
    %4 = vector.load %arg3[%c0_3, %c0_4] : memref<1x128xf32, #tpu.memory_space<vmem>>, vector<1x128xf32>
    %5 = vector.broadcast %4 : vector<1x128xf32> to vector<2x128xf32>
    %6 = arith.addf %3, %5 : vector<2x128xf32>
    %7 = vector.extract_strided_slice %6 {offsets = [0, 0], sizes = [2, 4], strides = [1, 1]} : vector<2x128xf32> to vector<2x4xf32>
    %c0_5 = arith.constant 0 : index
    %c0_6 = arith.constant 0 : index
    %8 = vector.load %arg5[%c0_5, %c0_6] : memref<2x4xf32, #tpu.memory_space<vmem>>, vector<2x4xf32>
    tpu.vector_store %arg5[%c0_5, %c0_6], %7 {strides = array<i32>} : memref<2x4xf32, #tpu.memory_space<vmem>>, vector<2x4xf32>,
    %9 = tpu.iota {dimensions = array<i32: 1>} : vector<2x128xi32>
    %c4_i32 = arith.constant 4 : i32
    %10 = vector.broadcast %c4_i32 : i32 to vector<2x128xi32>
    %11 = arith.cmpi slt, %9, %10 : vector<2x128xi32>
    %cst_7 = arith.constant -1.000000e+30 : f32
    %12 = vector.broadcast %cst_7 : f32 to vector<2x128xf32>
    %13 = arith.select %11, %6, %12 : vector<2x128xi1>, vector<2x128xf32>
    %cst_8 = arith.constant dense<0xFF800000> : vector<2xf32>
    %14 = vector.multi_reduction <maximumf>, %13, %cst_8 [1] : vector<2x128xf32> to vector<2xf32>
    %15 = vector.shape_cast %14 : vector<2xf32> to vector<2x1xf32>
    %16 = vector.broadcast %15 : vector<2x1xf32> to vector<2x128xf32>
    %17 = arith.subf %13, %16 : vector<2x128xf32>
    %18 = math.exp %17 : vector<2x128xf32>
    %cst_9 = arith.constant dense<0.000000e+00> : vector<2xf32>
    %19 = vector.multi_reduction <add>, %18, %cst_9 [1] : vector<2x128xf32> to vector<2xf32>
    %20 = vector.shape_cast %19 : vector<2xf32> to vector<2x1xf32>
    %21 = math.log %20 : vector<2x1xf32>
    %22 = arith.addf %15, %21 : vector<2x1xf32>
    %c0_10 = arith.constant 0 : index
    %c0_11 = arith.constant 0 : index
    %23 = vector.load %arg4[%c0_10, %c0_11] : memref<2x1xi32, #tpu.memory_space<vmem>>, vector<2x1xi32>
    %24 = vector.broadcast %23 : vector<2x1xi32> to vector<2x128xi32>
    %25 = arith.cmpi eq, %9, %24 : vector<2x128xi32>
    %26 = arith.extui %25 : vector<2x128xi1> to vector<2x128xi32>
    %27 = arith.sitofp %26 : vector<2x128xi32> to vector<2x128xf32>
    %28 = arith.mulf %6, %27 : vector<2x128xf32>
    %cst_12 = arith.constant dense<0.000000e+00> : vector<2xf32>
    %29 = vector.multi_reduction <add>, %28, %cst_12 [1] : vector<2x128xf32> to vector<2xf32>
    %30 = vector.shape_cast %29 : vector<2xf32> to vector<2x1xf32>
    %c2_i32 = arith.constant 2 : i32
    %31 = arith.muli %arg0, %c2_i32 : i32
    %32 = tpu.iota {dimensions = array<i32: 0>} : vector<2x1xi32>
    %33 = vector.broadcast %31 : i32 to vector<2x1xi32>
    %34 = arith.addi %33, %32 : vector<2x1xi32>
    %c2_i32_13 = arith.constant 2 : i32
    %35 = vector.broadcast %c2_i32_13 : i32 to vector<2x1xi32>
    %36 = arith.cmpi slt, %34, %35 : vector<2x1xi32>
    %37 = arith.subf %22, %30 : vector<2x1xf32>
    %cst_14 = arith.constant 0.000000e+00 : f32
    %38 = vector.broadcast %cst_14 : f32 to vector<2x1xf32>
    %39 = arith.select %36, %37, %38 : vector<2x1xi1>, vector<2x1xf32>
    %40 = vector.shape_cast %39 : vector<2x1xf32> to vector<1x2x1xf32>
    %cst_15 = arith.constant dense<0.000000e+00> : vector<1xf32>
    %41 = vector.multi_reduction <add>, %40, %cst_15 [1, 2] : vector<1x2x1xf32> to vector<1xf32>
    %42 = vector.shape_cast %41 : vector<1xf32> to vector<1x1x1xf32>
    %43 = vector.extract %42[0, 0, 0] : f32 from vector<1x1x1xf32>
    %44 = vector.broadcast %43 : f32 to vector<1x8x128xf32>
    %c0_16 = arith.constant 0 : index
    %c0_17 = arith.constant 0 : index
    %c0_18 = arith.constant 0 : index
    %45 = vector.load %arg6[%c0_16, %c0_17, %c0_18] : memref<1x8x128xf32, #tpu.memory_space<vmem>>, vector<1x8x128xf32>
    tpu.vector_store %arg6[%c0_16, %c0_17, %c0_18], %44 {strides = array<i32>} : memref<1x8x128xf32, #tpu.memory_space<vmem>>, vector<1x8x128xf32>,
    return
  }
  func.func @transform_0(%arg0: i32) -> (i32, i32) {
    %c0_i32 = arith.constant 0 : i32
    %c0_i32_0 = arith.constant 0 : i32
    return %arg0, %c0_i32 : i32, i32
  }
  func.func @transform_1(%arg0: i32) -> (i32, i32) {
    %c0_i32 = arith.constant 0 : i32
    %c0_i32_0 = arith.constant 0 : i32
    %c0_i32_1 = arith.constant 0 : i32
    return %c0_i32, %c0_i32_0 : i32, i32
  }
  func.func @transform_2(%arg0: i32) -> (i32, i32) {
    %c0_i32 = arith.constant 0 : i32
    %c0_i32_0 = arith.constant 0 : i32
    %c0_i32_1 = arith.constant 0 : i32
    return %c0_i32, %c0_i32_0 : i32, i32
  }
  func.func @transform_3(%arg0: i32) -> (i32, i32) {
    %c0_i32 = arith.constant 0 : i32
    %c0_i32_0 = arith.constant 0 : i32
    return %arg0, %c0_i32 : i32, i32
  }
  func.func @transform_4(%arg0: i32) -> (i32, i32) {
    %c0_i32 = arith.constant 0 : i32
    %c0_i32_0 = arith.constant 0 : i32
    return %arg0, %c0_i32 : i32, i32
  }
  func.func @transform_5(%arg0: i32) -> (i32, i32, i32) {
    %c0_i32 = arith.constant 0 : i32
    %c0_i32_0 = arith.constant 0 : i32
    %c0_i32_1 = arith.constant 0 : i32
    return %arg0, %c0_i32, %c0_i32_0 : i32, i32, i32
  }
}

</mosaic_0001>

<bundles_post_ra>
// kernel: tpu_custom_call.1
= control target key start
LH: loop header
LB: loop body
LE: loop exit
PB: predicated region body
PF: predicated region fallthrough
CT: control target
= control target key end

     0   :  { %11 = vsyncpa [#allocation3], 0  ;;  %s1047_s0 = inlined_call_operand.hbm [shape: f32[2,768], index: 0, kind: input, shape index: {}]   ;;  %s1048_s1 = inlined_call_operand.hbm [shape: bf16[768,128], index: 1, kind: input, shape index: {}]   ;;  %s1049_s2 = inlined_call_operand.vmem [shape: f32[1,128], index: 2, kind: input, shape index: {}]   ;;  %s1050_s3 = inlined_call_operand.vmem [shape: s32[2,1], index: 3, kind: input, shape index: {}]   ;;  %s1051_s4 = inlined_call_operand.hbm [shape: f32[2,4], index: 4, kind: output, shape index: {0}]   ;;  %s1052_s5 = inlined_call_operand.hbm [shape: f32[1,8,128], index: 5, kind: output, shape index: {1}]  }
   0x1   :  { %12 = vsyncpa [#allocation6], 0 }
   0x2   :  { %13 = vsyncpa [#allocation4], 0 }
   0x3   :  { %14 = vsyncpa [#allocation9], 0  ;;  %s20_s20 = sshll.u32 %s1047_s0, 4  ;;  %s988_s21 = smov [#allocation2]   ;;  %s21_s20 = int_to_ptr.hbm [resolvable:$true] %s20_s20 }
   0x4   :  { %s22_s22 = sshll.u32 %s988_s21, 4  ;;  %s30_s25 = sshll.u32 %s1048_s1, 4  ;;  %s23_s22 = int_to_ptr.vmem [resolvable:$true] %s22_s22  ;;  %s31_s25 = int_to_ptr.hbm [resolvable:$true] %s30_s25 }
   0x5   :  { %25 = dma.hbm_to_vmem [thread:$0]  %s21_s20, 192, %s23_s22, [#allocation3]  }
   0x6   :  { %s989_s26 = smov [#allocation5]   ;;  %s990_s28 = smov 64  }
   0x7   :  { %s32_s27 = sshll.u32 %s989_s26, 4  ;;  %s991_s29 = smov 4   ;;  %s33_s27 = int_to_ptr.vmem [resolvable:$true] %s32_s27 }
   0x8   :  { %38 = dma.hbm_to_vmem [thread:$0]  %s31_s25, 6144, %s33_s27, [#allocation6], %s990_s28, %s990_s28, %s991_s29  }
   0x9   :  { %980 = dma.done.wait [#allocation3], 192  }
   0xa   :  { %981 = vsyncadd [#allocation3], 4294967104 }
   0xb   :  { %982 = dma.done.wait [#allocation6], 6144  }
   0xc   :  { %983 = vsyncadd [#allocation6], 4294961152  ;;  %v827_v0 = vld [vmem:[#allocation5 + $0x38] sm:$0xff]  ;;  %v826_v2 = vld [vmem:[#allocation5 + $0x30] sm:$0xff]  ;;  %vm542_vm1 = vcmask 25600   ;;  %vm548_vm2 = vcmask 1041408  }
   0xd   :  { %v835_v1 = vld [vmem:[#allocation5 + $0x78] sm:$0xff]  ;;  %464 = vmatpush.bf16.msra.mxu0 %v827_v0  ;;  %v834_v3 = vld [vmem:[#allocation5 + $0x70] sm:$0xff]  ;;  %v825_v8 = vld [vmem:[#allocation5 + $0x28] sm:$0xff]  ;;  %v992_v0 = vmov 0   ;;  %vm580_vm5 = vcmask 1024   ;;  %s600_s9 = sshll.u32 %s1051_s4, 4  ;;  %s601_s9 = int_to_ptr.hbm [resolvable:$true] %s600_s9 }
   0xe   :  { %477 = vmatpush.bf16.msra.mxu1 %v835_v1  ;;  %v843_v4 = vld [vmem:[#allocation5 + $0xb8] sm:$0xff]  ;;  %v842_v6 = vld [vmem:[#allocation5 + $0xb0] sm:$0xff]  ;;  %v833_v9 = vld [vmem:[#allocation5 + $0x68] sm:$0xff]  ;;  %878 = vset.pattern.permute.xlu0 %v992_v0  ;;  %s995_s10 = smov [#allocation8]   ;;  %s611_s14 = sshll.u32 %s1052_s5, 4  ;;  %s612_s14 = int_to_ptr.hbm [resolvable:$true] %s611_s14 }
   0xf   :  { %v851_v5 = vld [vmem:[#allocation5 + $0xf8] sm:$0xff]  ;;  %490 = vmatpush.bf16.msra.mxu2 %v843_v4  ;;  %v850_v7 = vld [vmem:[#allocation5 + $0xf0] sm:$0xff]  ;;  %v841_v10 = vld [vmem:[#allocation5 + $0xa8] sm:$0xff]  ;;  %s609_s11 = sshll.u32 %s995_s10, 4  ;;  %s610_s11 = int_to_ptr.vmem [resolvable:$true] %s609_s11 }
  0x10   :  { %503 = vmatpush.bf16.msra.mxu3 %v851_v5  ;;  %v849_v11 = vld [vmem:[#allocation5 + $0xe8] sm:$0xff]  ;;  %v824_v12 = vld [vmem:[#allocation5 + $0x20] sm:$0xff]  ;;  %v51_v14 = vld [vmem:[#allocation2] sm:$0xff] }
  0x11   :  { %465 = vmatpush.bf16.msra.mxu0 %v826_v2  ;;  %v832_v13 = vld [vmem:[#allocation5 + $0x60] sm:$0xff]  ;;  %55 = vst [vmem:[#allocation1] ss:$4 sm:$0xff] %v51_v14  ;;  %v823_v17 = vld [vmem:[#allocation5 + $0x18] sm:$0xff]  ;;  %v822_v21 = vld [vmem:[#allocation5 + $0x10] sm:$0xff] }
  0x12   :  { %478 = vmatpush.bf16.msra.mxu1 %v834_v3  ;;  %v840_v15 = vld [vmem:[#allocation5 + $0xa0] sm:$0xff]  ;;  %v831_v18 = vld [vmem:[#allocation5 + $0x58] sm:$0xff]  ;;  %v830_v22 = vld [vmem:[#allocation5 + $0x50] sm:$0xff] }
  0x13   :  { %491 = vmatpush.bf16.msra.mxu2 %v842_v6  ;;  %v848_v16 = vld [vmem:[#allocation5 + $0xe0] sm:$0xff]  ;;  %v839_v19 = vld [vmem:[#allocation5 + $0x98] sm:$0xff]  ;;  %v838_v23 = vld [vmem:[#allocation5 + $0x90] sm:$0xff] }
  0x14   :  { %504 = vmatpush.bf16.msra.mxu3 %v850_v7  ;;  %v847_v20 = vld [vmem:[#allocation5 + $0xd8] sm:$0xff]  ;;  %v846_v24 = vld [vmem:[#allocation5 + $0xd0] sm:$0xff]  ;;  %v821_v26 = vld [vmem:[#allocation5 + $0x8] sm:$0xff] }
  0x15   :  { %466 = vmatpush.bf16.msra.mxu0 %v825_v8  ;;  %v52_v25 = vld [vmem:[#allocation2 + $0x8] sm:$0xf]  ;;  %v829_v27 = vld [vmem:[#allocation5 + $0x48] sm:$0xff]  ;;  %v820_v29 = vld [vmem:[#allocation5] sm:$0xff] }
  0x16   :  { %479 = vmatpush.bf16.msra.mxu1 %v833_v9  ;;  %57 = vst [vmem:[#allocation1 + $0x20] ss:$4 sm:$0xff] %v52_v25  ;;  %v837_v28 = vld [vmem:[#allocation5 + $0x88] sm:$0xff]  ;;  %v828_v30 = vld [vmem:[#allocation5 + $0x40] sm:$0xff]  ;;  %v859_v34 = vld [vmem:[#allocation5 + $0x138] sm:$0xff] }
  0x17   :  { %492 = vmatpush.bf16.msra.mxu2 %v841_v10  ;;  %v845_v31 = vld [vmem:[#allocation5 + $0xc8] sm:$0xff]  ;;  %v867_v35 = vld [vmem:[#allocation5 + $0x178] sm:$0xff]  ;;  %v836_v36 = vld [vmem:[#allocation5 + $0x80] sm:$0xff]  ;;  %v544_v10 = vlaneseq }
  0x18   :  { %505 = vmatpush.bf16.msra.mxu3 %v849_v11  ;;  %v58_v32 = vld.sshfl [vmem:[#allocation1] sm:$0xff pattern:$0x73625140]  ;;  %v59_v33 = vld.sshfl [vmem:[#allocation1 + $0x8] sm:$0xff pattern:$0x73625140] }
  0x19   :  { %467 = vmatpush.bf16.msra.mxu0 %v824_v12  ;;  %v70_v37 = vpack.c.bf16 %v58_v32, %v58_v32  ;;  %v71_v38 = vpack.c.bf16 %v59_v33, %v59_v33  ;;  %v60_v39 = vld.sshfl [vmem:[#allocation1 + $0x10] sm:$0xff pattern:$0x73625140]  ;;  %v61_v41 = vld.sshfl [vmem:[#allocation1 + $0x18] sm:$0xff pattern:$0x73625140] }
  0x1a   :  { %480 = vmatpush.bf16.msra.mxu1 %v832_v13  ;;  %v844_v40 = vld [vmem:[#allocation5 + $0xc0] sm:$0xff]  ;;  %v858_v42 = vld [vmem:[#allocation5 + $0x130] sm:$0xff]  ;;  %v72_v44 = vpack.c.bf16 %v60_v39, %v60_v39  ;;  %v73_v45 = vpack.c.bf16 %v61_v41, %v61_v41  ;;  %v857_v46 = vld [vmem:[#allocation5 + $0x128] sm:$0xff]  ;;  %v545_v12 = vand.u32 127, %v544_v10 }
  0x1b   :  { %493 = vmatpush.bf16.msra.mxu2 %v840_v15  ;;  %v866_v43 = vld [vmem:[#allocation5 + $0x170] sm:$0xff]  ;;  %v865_v47 = vld [vmem:[#allocation5 + $0x168] sm:$0xff]  ;;  %v856_v48 = vld [vmem:[#allocation5 + $0x120] sm:$0xff] }
  0x1c   :  { %506 = vmatpush.bf16.msra.mxu3 %v848_v16  ;;  %v864_v49 = vld [vmem:[#allocation5 + $0x160] sm:$0xff]  ;;  %v855_v50 = vld [vmem:[#allocation5 + $0x118] sm:$0xff]  ;;  %v854_v52 = vld [vmem:[#allocation5 + $0x110] sm:$0xff]  ;;  %vm546_vm0 = vcmp.lt.s32.totalorder %v545_v12, 4 }
  0x1d   :  { %468 = vmatpush.bf16.msra.mxu0 %v823_v17  ;;  %v863_v51 = vld [vmem:[#allocation5 + $0x158] sm:$0xff]  ;;  %v862_v53 = vld [vmem:[#allocation5 + $0x150] sm:$0xff]  ;;  %v853_v54 = vld [vmem:[#allocation5 + $0x108] sm:$0xff] }
  0x1e   :  { %481 = vmatpush.bf16.msra.mxu1 %v831_v18  ;;  %v861_v55 = vld [vmem:[#allocation5 + $0x148] sm:$0xff]  ;;  %v852_v56 = vld [vmem:[#allocation5 + $0x100] sm:$0xff]  ;;  %v63_v59 = vld.sshfl [vmem:[#allocation1 + $0x28] sm:$0xff pattern:$0x73625140] }
  0x1f   :  { %494 = vmatpush.bf16.msra.mxu2 %v839_v19  ;;  %v860_v57 = vld [vmem:[#allocation5 + $0x140] sm:$0xff]  ;;  %v62_v58 = vld.sshfl [vmem:[#allocation1 + $0x20] sm:$0xff pattern:$0x73625140]  ;;  %v75_v61 = vpack.c.bf16 %v63_v59, %v63_v59 }
  0x20   :  { %507 = vmatpush.bf16.msra.mxu3 %v847_v20  ;;  %v74_v60 = vpack.c.bf16 %v62_v58, %v62_v58  ;;  %v879_v5 = vld [vmem:[%s1049_s2] ss:$0 sm:$0xff] }
  0x21   :  { %469 = vmatpush.bf16.msra.mxu0 %v822_v21 }
  0x22   :  { %482 = vmatpush.bf16.msra.mxu1 %v830_v22  ;;  %v561_v22 = vld [vmem:[%s1050_s3] sm:$0x3]  ;;  %s994_s3 = smov [#allocation7]  }
  0x23   :  { %495 = vmatpush.bf16.msra.mxu2 %v838_v23  ;;  %s598_s6 = sshll.u32 %s994_s3, 4  ;;  %s599_s6 = int_to_ptr.vmem [resolvable:$true] %s598_s6 }
  0x24   :  { %508 = vmatpush.bf16.msra.mxu3 %v846_v24 }
  0x25   :  { %470 = vmatpush.bf16.msra.mxu0 %v821_v26 }
  0x26   :  { %483 = vmatpush.bf16.msra.mxu1 %v829_v27 }
  0x27   :  { %496 = vmatpush.bf16.msra.mxu2 %v837_v28 }
  0x28   :  { %509 = vmatpush.bf16.msra.mxu3 %v845_v31 }
  0x29   :  { %471 = vmatpush.bf16.msra.mxu0 %v820_v29  ;;  %v993_v29 = vmov 0.0  }
  0x2a   :  { %484 = vmatpush.bf16.msra.mxu1 %v828_v30 }
  0x2b   :  { %497 = vmatpush.bf16.msra.mxu2 %v836_v36  ;;  %v574_v36 = vshrl.u32 %v544_v10, 7 }
  0x2c   :  { %472 = vmatmul.bf16.vlgmr.msra.gmra.mxu0 %v70_v37  ;;  %510 = vmatpush.bf16.msra.mxu3 %v844_v40 }
  0x2d   :  { %516 = vmatpush.bf16.msrb.mxu0 %v859_v34  ;;  %485 = vmatmul.bf16.vlgmr.msra.gmra.mxu1 %v71_v38  ;;  %vm577_vm4 = vcmp.lt.s32.totalorder %v574_v36, 2 }
  0x2e   :  { %529 = vmatpush.bf16.msrb.mxu1 %v867_v35  ;;  %498 = vmatmul.bf16.vlgmr.msra.gmra.mxu2 %v72_v44 }
  0x2f   :  { %511 = vmatmul.bf16.vlgmr.msra.gmra.mxu3 %v73_v45 }
  0x31   :  { %517 = vmatpush.bf16.msrb.mxu0 %v858_v42 }
  0x32   :  { %530 = vmatpush.bf16.msrb.mxu1 %v866_v43 }
  0x35   :  { %518 = vmatpush.bf16.msrb.mxu0 %v857_v46 }
  0x36   :  { %531 = vmatpush.bf16.msrb.mxu1 %v865_v47 }
  0x39   :  { %519 = vmatpush.bf16.msrb.mxu0 %v856_v48 }
  0x3a   :  { %532 = vmatpush.bf16.msrb.mxu1 %v864_v49 }
  0x3d   :  { %520 = vmatpush.bf16.msrb.mxu0 %v855_v50 }
  0x3e   :  { %533 = vmatpush.bf16.msrb.mxu1 %v863_v51 }
  0x41   :  { %521 = vmatpush.bf16.msrb.mxu0 %v854_v52 }
  0x42   :  { %534 = vmatpush.bf16.msrb.mxu1 %v862_v53 }
  0x45   :  { %522 = vmatpush.bf16.msrb.mxu0 %v853_v54 }
  0x46   :  { %535 = vmatpush.bf16.msrb.mxu1 %v861_v55 }
  0x49   :  { %523 = vmatpush.bf16.msrb.mxu0 %v852_v56 }
  0x4a   :  { %536 = vmatpush.bf16.msrb.mxu1 %v860_v57 }
  0x4c   :  { %524 = vmatmul.bf16.vlgmr.msrb.gmra.mxu0 %v74_v60 }
  0x4d   :  { %537 = vmatmul.bf16.vlgmr.msrb.gmra.mxu1 %v75_v61 }
  0xa9   :  { %v473_v62 = vpop.f32.mrf.mxu0 }
  0xaa   :  { %v486_v63 = vpop.f32.mrf.mxu1  ;;  %v474_v6 = vadd.f32 %v879_v5, %v473_v62 }
  0xac   :  { %v487_v9 = vadd.f32 %v486_v63, %v474_v6 }
  0xb1   :  { %v475_v1 = vpop.f32.mrf.mxu0  ;;  %v499_v3 = vpop.f32.mrf.mxu2 }
  0xb2   :  { %v488_v2 = vpop.f32.mrf.mxu1  ;;  %v512_v4 = vpop.f32.mrf.mxu3  ;;  %v500_v11 = vadd.f32 %v499_v3, %v487_v9 }
  0xb4   :  { %v513_v13 = vadd.f32 %v512_v4, %v500_v11 }
  0xb9   :  { %v501_v7 = vpop.f32.mrf.mxu2 }
  0xba   :  { %v514_v8 = vpop.f32.mrf.mxu3 }
  0xc9   :  { %v525_v14 = vpop.f32.mrf.mxu0 }
  0xca   :  { %v538_v15 = vpop.f32.mrf.mxu1  ;;  %v526_v16 = vadd.f32 %v525_v14, %v513_v13 }
  0xcc   :  { %v539_v17 = vadd.f32 %v538_v15, %v526_v16 }
  0xce   :  { %v547_v18 = vsel %vm546_vm0, %v539_v17, -1e+30  ;;  %543 = vst.msk [vmem:[#allocation7] sm:$0x3] %vm542_vm1, %v539_v17 }
  0xcf   :  { %v549_v19 = vsel %vm548_vm2, %v547_v18, -inf  ;;  %603 = dma.vmem_to_hbm [thread:$0]  %s599_s6, 32, %s601_s9, [#allocation4]  }
  0xd0   :  { %550 = vmax.xlane.f32.xlu0 %v549_v19 }
  0xd1   :  { %v527_v20 = vpop.f32.mrf.mxu0 }
  0xd2   :  { %v540_v21 = vpop.f32.mrf.mxu1 }
  0xe4   :  { %563 = vperm.xlu0 %878, %v561_v22  }
 0x143   :  { %v551_v23 = vpop.xlane.xlu0 %550 }
 0x144   :  { %v552_v24 = vsub.f32 %v547_v18, %v551_v23 }
 0x146   :  { %v553_v25 = vmul.f32 1.442695, %v552_v24 }
 0x148   :  { %880 = vpow2.f32 %v553_v25 }
 0x14e   :  { %v881_v26 = vpop.eup %880 }
 0x14f   :  { %v555_v27 = vsel %vm548_vm2, %v881_v26, 0.0 }
 0x150   :  { %556 = vadd.xlane.f32.xlu1 %v555_v27 }
 0x156   :  { %v564_v28 = vpop.permute.xlu0 %563 }
 0x157   :  { %vm565_vm3 = vcmp.eq.s32.totalorder %v545_v12, %v564_v28 }
 0x158   :  { %v819_v30 = vsel %vm565_vm3, 1.0, %v993_v29 }
 0x159   :  { %v568_v31 = vmul.f32 %v819_v30, %v539_v17 }
 0x15b   :  { %v569_v32 = vsel %vm548_vm2, %v568_v31, 0.0 }
 0x15c   :  { %570 = vadd.xlane.f32.xlu1 %v569_v32 }
 0x1c3   :  { %v557_v33 = vpop.xlane.xlu1 %556 }
 0x1c4   :  { %882 = vlog2.f32 %v557_v33 }
 0x1ca   :  { %v883_v34 = vpop.eup %882 }
 0x1cb   :  { %v559_v35 = vmul.f32 0.6931472, %v883_v34 }
 0x1cd   :  { %v560_v37 = vadd.f32 %v559_v35, %v551_v23 }
 0x1cf   :  { %v571_v38 = vpop.xlane.xlu1 %570 }
 0x1d0   :  { %v578_v39 = vsub.f32 %v560_v37, %v571_v38 }
 0x1d2   :  { %v579_v40 = vsel %vm577_vm4, %v578_v39, 0.0 }
 0x1d3   :  { %v581_v41 = vsel %vm580_vm5, %v579_v40, 0.0 }
 0x1d4   :  { %582 = vadd.xlane.f32.xlu2 %v581_v41 }
 0x247   :  { %v583_v42 = vpop.xlane.xlu2 %582 }
 0x248   :  { %v584_v43 = vrot.slane %v583_v42, 4 }
 0x24a   :  { %v585_v44 = vadd.f32 %v584_v43, %v583_v42 }
 0x24c   :  { %v586_v45 = vrot.slane %v585_v44, 2 }
 0x24e   :  { %v587_v46 = vadd.f32 %v586_v45, %v585_v44 }
 0x250   :  { %v588_v47 = vrot.slane %v587_v46, 1 }
 0x252   :  { %v589_v48 = vadd.f32 %v588_v47, %v587_v46 }
 0x254   :  { %868 = vpush %v589_v48 }
 0x285   :  { %s869_s15 = spop %868 }
 0x286   :  { %v591_v49 = vstv %s869_s15 }
 0x287   :  { %592 = vst [vmem:[#allocation8] sm:$0xff] %v591_v49 }
 0x288   :  { %614 = dma.vmem_to_hbm [thread:$0]  %s610_s11, 128, %s612_s14, [#allocation9]  }
 0x289   :  { %984 = dma.done.wait [#allocation4], 32  }
 0x28a   :  { %985 = vsyncadd [#allocation4], 4294967264 }
 0x28b   :  { %986 = dma.done.wait [#allocation9], 128  }
 0x28c   :  { %987 = vsyncadd [#allocation9], 4294967168 }
 0x28d   :  { %623 = vsyncpa [#allocation3], 1 }
 0x28e   :  { %624 = vsyncpa [#allocation6], 1 }
 0x28f   :  { %625 = vsyncpa [#allocation4], 1 }
 0x290   :  { %626 = vsyncpa [#allocation9], 1 }

</bundles_post_ra>
